<compile_context>
chip_gen: v6e
topology: v6e:2x2x1
jax: 0.10.0
libtpu: 0.0.40
codegen_flags: <defaults>
</compile_context>

<pallas_src>
import jax
import jax.numpy as jnp
import numpy as np
from jax.experimental import pallas as pl
from jax.experimental.pallas import tpu as pltpu

# ---- model hyper-parameters (small, consistent with the module) ----
BATCH = 2
SEQ_LEN = 8
EMBED = 16
VOCAB = 20
NUM_FILTERS = 4
FILTER_SIZES = (2, 3, 4)
NUM_CLASSES = 2
NUM_FILTERS_TOTAL = NUM_FILTERS * len(FILTER_SIZES)

FS_MAX = max(FILTER_SIZES)          # 4 taps after zero-padding every filter bank
S_PAD = 16                          # per-batch row block: >= SEQ_LEN, sublane multiple, pow2
NROWS = BATCH * S_PAD               # 32 flat (batch, position) rows
K_TAPS = FS_MAX * EMBED             # 64: contraction dim of the fused conv matmul
C_PAD = 128                         # lane-dense classifier output width

assert S_PAD >= SEQ_LEN
assert S_PAD % 8 == 0 and (S_PAD & (S_PAD - 1)) == 0          # sublane aligned, pow2 for & mask
# rows wrapped around by the tap rolls land at t >= S_PAD - FS_MAX + 1; they must be
# invalid (masked) for every filter size so the wrap never pollutes a pooled value.
assert S_PAD - FS_MAX + 1 >= SEQ_LEN - min(FILTER_SIZES) + 1


def textcnn_kernel(ids_ref, table_ref, wf_ref, bf_ref, wt_ref, bt_ref, out_ref):
    """Single invocation; all operands fit comfortably in VMEM at these shapes."""
    # ---- embedding lookup as a one-hot matmul (pad ids = -1 -> zero rows) ----
    # TODO(synk): for realistic vocab sizes replace the one-hot matmul with a real
    # gather (table in HBM via memory_space=pl.ANY + per-row DMA, or scalar-prefetched
    # ids driving a pl.Element(1) row-gather index_map).
    ids = ids_ref[...]                                                      # [NROWS, 1] int32
    v_iota = jax.lax.broadcasted_iota(jnp.int32, (NROWS, VOCAB), 1)
    onehot = (ids == v_iota).astype(jnp.bfloat16)                           # [NROWS, V]
    x = jnp.dot(onehot, table_ref[...],
                preferred_element_type=jnp.float32)                         # [NROWS, E] f32

    # ---- fused conv: stack FS_MAX tap views with XLU rolls, one K=K_TAPS matmul ----
    # roll by (NROWS - k) == roll by -k: row r sees original row (r + k) % NROWS.
    # Wrapped / cross-block rows only reach positions t >= S_PAD - FS_MAX + 1, all masked.
    taps = [x] + [pltpu.roll(x, shift=NROWS - k, axis=0) for k in range(1, FS_MAX)]
    x_taps = jnp.concatenate(taps, axis=-1).astype(jnp.bfloat16)            # [NROWS, K_TAPS]
    acc = jnp.dot(x_taps, wf_ref[...],
                  preferred_element_type=jnp.float32)                       # [NROWS, F_total]

    # ---- bias + ReLU, zero invalid conv positions (exact: pooled post-ReLU max >= 0) ----
    h = jnp.maximum(acc + bf_ref[...], 0.0)                                 # [NROWS, F_total]
    t_row = jax.lax.broadcasted_iota(
        jnp.int32, (NROWS, NUM_FILTERS_TOTAL), 0) & (S_PAD - 1)             # position within block
    col = jax.lax.broadcasted_iota(jnp.int32, (NROWS, NUM_FILTERS_TOTAL), 1)
    limit = jnp.zeros((NROWS, NUM_FILTERS_TOTAL), jnp.int32)
    for i, fs in enumerate(FILTER_SIZES):                                   # static, 3 iterations
        in_band = (col >= i * NUM_FILTERS) & (col < (i + 1) * NUM_FILTERS)
        limit = jnp.where(in_band, SEQ_LEN - fs + 1, limit)
    h = jnp.where(t_row < limit, h, 0.0)

    # ---- max-pool over the sublane-aligned S_PAD block of each batch element ----
    pooled = jnp.max(h.reshape(BATCH, S_PAD, NUM_FILTERS_TOTAL), axis=1)    # [B, F_total]

    # ---- classifier: one matmul, lane-dense [B, C_PAD] store ----
    out_ref[...] = (jnp.dot(pooled.astype(jnp.bfloat16), wt_ref[...],
                            preferred_element_type=jnp.float32) + bt_ref[...])


def prepare_params(emb_table, conv_ws, conv_bs, lin_w, lin_b):
    """One-time parameter re-layout, kept out of the per-call path."""
    # Fused conv weight: zero-pad each bank to FS_MAX taps, stack along the filter axis,
    # then flatten taps into the contraction dim -> [FS_MAX*E, F_total].
    wf = np.zeros((FS_MAX, EMBED, NUM_FILTERS_TOTAL), np.float32)
    for i, (fs, w) in enumerate(zip(FILTER_SIZES, conv_ws)):
        # torch Conv2d weight [F, 1, fs, E] with in-channel squeezed -> [F, fs, E];
        # per-tap layout [fs, E, F] so tap k rows k*E:(k+1)*E form a ready matmul operand.
        wf[:fs, :, i * NUM_FILTERS:(i + 1) * NUM_FILTERS] = np.transpose(
            np.asarray(w, np.float32), (1, 2, 0))
    wf_flat = wf.reshape(K_TAPS, NUM_FILTERS_TOTAL)
    bf = np.concatenate([np.asarray(b, np.float32).reshape(1, NUM_FILTERS)
                         for b in conv_bs], axis=1)                          # [1, F_total]

    # Classifier weight/bias transposed and zero-padded to a lane-dense C_PAD block.
    wt_pad = np.zeros((NUM_FILTERS_TOTAL, C_PAD), np.float32)
    wt_pad[:, :NUM_CLASSES] = np.asarray(lin_w, np.float32).T
    bt_pad = np.zeros((1, C_PAD), np.float32)
    bt_pad[0, :NUM_CLASSES] = np.asarray(lin_b, np.float32)

    return (jnp.asarray(emb_table, dtype=jnp.bfloat16),    # [V, E]
            jnp.asarray(wf_flat, dtype=jnp.bfloat16),      # [K_TAPS, F_total]
            jnp.asarray(bf, dtype=jnp.float32),            # [1, F_total]
            jnp.asarray(wt_pad, dtype=jnp.bfloat16),       # [F_total, C_PAD]
            jnp.asarray(bt_pad, dtype=jnp.float32))        # [1, C_PAD]


def _cost_estimate():
    flops = (2 * NROWS * VOCAB * EMBED                          # one-hot embedding matmul
             + 2 * NROWS * K_TAPS * NUM_FILTERS_TOTAL           # fused conv matmul
             + 2 * BATCH * NUM_FILTERS_TOTAL * C_PAD)           # classifier matmul
    bytes_accessed = (4 * NROWS                                 # ids (int32)
                      + 2 * VOCAB * EMBED                       # bf16 table
                      + 2 * K_TAPS * NUM_FILTERS_TOTAL          # bf16 fused conv weight
                      + 4 * NUM_FILTERS_TOTAL                   # conv bias
                      + 2 * NUM_FILTERS_TOTAL * C_PAD           # bf16 classifier weight
                      + 4 * C_PAD                               # classifier bias
                      + 4 * BATCH * C_PAD)                      # output block
    return pl.CostEstimate(flops=flops, transcendentals=0, bytes_accessed=bytes_accessed)


@jax.jit
def textcnn_forward(X, params):
    table, wf_flat, bf, wt_pad, bt_pad = params
    # Pad token ids with -1 (matches no vocab entry -> zero embedding row). Pad-row
    # content never reaches an unmasked pooled value anyway (zero taps / masked positions).
    ids_pad = jnp.concatenate(
        [X.astype(jnp.int32),
         jnp.full((BATCH, S_PAD - SEQ_LEN), -1, dtype=jnp.int32)], axis=1
    ).reshape(NROWS, 1)

    vmem = pl.BlockSpec(memory_space=pltpu.MemorySpace.VMEM)
    # TODO(synk): if batch/seq scale up, add grid=(B//TILE_B,) with
    # dimension_semantics=("parallel",) so the grid shards across both v7x TensorCores,
    # and re-derive tile sizes against v7x's 64 MiB VMEM.
    out = pl.pallas_call(
        textcnn_kernel,
        out_shape=jax.ShapeDtypeStruct((BATCH, C_PAD), jnp.float32),
        in_specs=[vmem] * 6,
        out_specs=vmem,
        cost_estimate=_cost_estimate(),
    )(ids_pad, table, wf_flat, bf, wt_pad, bt_pad)
    return out[:, :NUM_CLASSES]


def reference_forward(X, emb_table, conv_ws, conv_bs, lin_w, lin_b):
    """Pure-JAX replica of the torch forward for verification."""
    emb = emb_table[X]                                          # [B, S, E]
    pooled_all = []
    for fs, w, b in zip(FILTER_SIZES, conv_ws, conv_bs):
        L = SEQ_LEN - fs + 1
        outs = []
        for t in range(L):
            window = emb[:, t:t + fs, :]                        # [B, fs, E]
            outs.append(jnp.einsum('bke,fke->bf', window, w) + b)
        h = jnp.maximum(jnp.stack(outs, axis=1), 0.0)           # [B, L, F]
        pooled_all.append(jnp.max(h, axis=1))                   # [B, F]
    h_pool = jnp.concatenate(pooled_all, axis=-1)               # [B, F_total]
    return h_pool @ lin_w.T + lin_b


if __name__ == "__main__":
    key = jax.random.PRNGKey(0)
    k_x, k_emb, k_lin, *k_convs = jax.random.split(key, 3 + len(FILTER_SIZES))

    X = jax.random.randint(k_x, (BATCH, SEQ_LEN), 0, VOCAB, dtype=jnp.int32)
    emb_table = jax.random.normal(k_emb, (VOCAB, EMBED), jnp.float32) * 0.1

    conv_ws, conv_bs = [], []
    for fs, kc in zip(FILTER_SIZES, k_convs):
        kw, kb = jax.random.split(kc)
        conv_ws.append(jax.random.normal(kw, (NUM_FILTERS, fs, EMBED), jnp.float32) * 0.1)
        conv_bs.append(jax.random.normal(kb, (NUM_FILTERS,), jnp.float32) * 0.1)

    lin_w = jax.random.normal(k_lin, (NUM_CLASSES, NUM_FILTERS_TOTAL), jnp.float32) * 0.1
    lin_b = jnp.ones((NUM_CLASSES,), jnp.float32)   # matches torch.ones([num_classes])

    params = prepare_params(emb_table, conv_ws, conv_bs, lin_w, lin_b)

    out = textcnn_forward(X, params)
    out = jax.block_until_ready(out)

    ref = reference_forward(X, emb_table, conv_ws, conv_bs, lin_w, lin_b)
    np.testing.assert_allclose(np.asarray(out), np.asarray(ref), rtol=5e-2, atol=5e-2)

    print("KERNEL_OK")
</pallas_src>

<mosaic_0001>
module attributes {stable_mosaic.version = 11 : i64} {
  func.func @textcnn_kernel(%arg0: memref<32x1xi32, #tpu.memory_space<vmem>>, %arg1: memref<20x16xbf16, #tpu.memory_space<vmem>>, %arg2: memref<64x12xbf16, #tpu.memory_space<vmem>>, %arg3: memref<1x12xf32, #tpu.memory_space<vmem>>, %arg4: memref<12x128xbf16, #tpu.memory_space<vmem>>, %arg5: memref<1x128xf32, #tpu.memory_space<vmem>>, %arg6: memref<2x128xf32, #tpu.memory_space<vmem>>) attributes {dimension_semantics = [], scalar_prefetch = 0 : i64, scratch_operands = 0 : i64, tpu.core_type = #tpu.core_type<tc>} {
    %c0 = arith.constant 0 : index
    %c0_0 = arith.constant 0 : index
    %0 = vector.load %arg0[%c0, %c0_0] : memref<32x1xi32, #tpu.memory_space<vmem>>, vector<32x1xi32>
    %1 = tpu.iota {dimensions = array<i32: 1>} : vector<32x20xi32>
    %2 = vector.broadcast %0 : vector<32x1xi32> to vector<32x20xi32>
    %3 = arith.cmpi eq, %2, %1 : vector<32x20xi32>
    %4 = arith.extui %3 : vector<32x20xi1> to vector<32x20xi32>
    %5 = arith.sitofp %4 : vector<32x20xi32> to vector<32x20xf32>
    %6 = arith.truncf %5 : vector<32x20xf32> to vector<32x20xbf16>
    %c0_1 = arith.constant 0 : index
    %c0_2 = arith.constant 0 : index
    %7 = vector.load %arg1[%c0_1, %c0_2] : memref<20x16xbf16, #tpu.memory_space<vmem>>, vector<20x16xbf16>
    %cst = arith.constant dense<0.000000e+00> : vector<32x16xf32>
    %8 = tpu.matmul %6, %7, %cst {dimension_numbers = #tpu.dot_dimension_numbers<[1], [0], [0], [1], [0, 0, 1, 1], [], []>} : vector<32x20xbf16>, vector<20x16xbf16>, vector<32x16xf32> -> vector<32x16xf32>
    %c31_i32 = arith.constant 31 : i32
    %9 = tpu.dynamic_rotate %8 by %c31_i32 dim 0 : vector<32x16xf32>, i32 -> vector<32x16xf32>
    %c30_i32 = arith.constant 30 : i32
    %10 = tpu.dynamic_rotate %8 by %c30_i32 dim 0 : vector<32x16xf32>, i32 -> vector<32x16xf32>
    %c29_i32 = arith.constant 29 : i32
    %11 = tpu.dynamic_rotate %8 by %c29_i32 dim 0 : vector<32x16xf32>, i32 -> vector<32x16xf32>
    %12 = tpu.concatenate %8, %9, %10, %11 in 1 : vector<32x16xf32>, vector<32x16xf32>, vector<32x16xf32>, vector<32x16xf32> -> vector<32x64xf32>
    %13 = arith.truncf %12 : vector<32x64xf32> to vector<32x64xbf16>
    %c0_3 = arith.constant 0 : index
    %c0_4 = arith.constant 0 : index
    %14 = vector.load %arg2[%c0_3, %c0_4] : memref<64x12xbf16, #tpu.memory_space<vmem>>, vector<64x12xbf16>
    %cst_5 = arith.constant dense<0.000000e+00> : vector<32x12xf32>
    %15 = tpu.matmul %13, %14, %cst_5 {dimension_numbers = #tpu.dot_dimension_numbers<[1], [0], [0], [1], [0, 0, 1, 1], [], []>} : vector<32x64xbf16>, vector<64x12xbf16>, vector<32x12xf32> -> vector<32x12xf32>
    %c0_6 = arith.constant 0 : index
    %c0_7 = arith.constant 0 : index
    %16 = vector.load %arg3[%c0_6, %c0_7] : memref<1x12xf32, #tpu.memory_space<vmem>>, vector<1x12xf32>
    %17 = vector.broadcast %16 : vector<1x12xf32> to vector<32x12xf32>
    %18 = arith.addf %15, %17 : vector<32x12xf32>
    %cst_8 = arith.constant 0.000000e+00 : f32
    %19 = vector.broadcast %cst_8 : f32 to vector<32x12xf32>
    %20 = arith.maximumf %18, %19 : vector<32x12xf32>
    %21 = tpu.iota {dimensions = array<i32: 0>} : vector<32x12xi32>
    %c15_i32 = arith.constant 15 : i32
    %22 = vector.broadcast %c15_i32 : i32 to vector<32x12xi32>
    %23 = arith.andi %21, %22 : vector<32x12xi32>
    %24 = tpu.iota {dimensions = array<i32: 1>} : vector<32x12xi32>
    %c0_i32 = arith.constant 0 : i32
    %25 = vector.broadcast %c0_i32 : i32 to vector<32x12xi32>
    %c0_i32_9 = arith.constant 0 : i32
    %26 = vector.broadcast %c0_i32_9 : i32 to vector<32x12xi32>
    %27 = arith.cmpi sge, %24, %26 : vector<32x12xi32>
    %c4_i32 = arith.constant 4 : i32
    %28 = vector.broadcast %c4_i32 : i32 to vector<32x12xi32>
    %29 = arith.cmpi slt, %24, %28 : vector<32x12xi32>
    %30 = arith.andi %27, %29 : vector<32x12xi1>
    %c7_i32 = arith.constant 7 : i32
    %31 = vector.broadcast %c7_i32 : i32 to vector<32x12xi32>
    %32 = arith.select %30, %31, %25 : vector<32x12xi1>, vector<32x12xi32>
    %c4_i32_10 = arith.constant 4 : i32
    %33 = vector.broadcast %c4_i32_10 : i32 to vector<32x12xi32>
    %34 = arith.cmpi sge, %24, %33 : vector<32x12xi32>
    %c8_i32 = arith.constant 8 : i32
    %35 = vector.broadcast %c8_i32 : i32 to vector<32x12xi32>
    %36 = arith.cmpi slt, %24, %35 : vector<32x12xi32>
    %37 = arith.andi %34, %36 : vector<32x12xi1>
    %c6_i32 = arith.constant 6 : i32
    %38 = vector.broadcast %c6_i32 : i32 to vector<32x12xi32>
    %39 = arith.select %37, %38, %32 : vector<32x12xi1>, vector<32x12xi32>
    %c8_i32_11 = arith.constant 8 : i32
    %40 = vector.broadcast %c8_i32_11 : i32 to vector<32x12xi32>
    %41 = arith.cmpi sge, %24, %40 : vector<32x12xi32>
    %c12_i32 = arith.constant 12 : i32
    %42 = vector.broadcast %c12_i32 : i32 to vector<32x12xi32>
    %43 = arith.cmpi slt, %24, %42 : vector<32x12xi32>
    %44 = arith.andi %41, %43 : vector<32x12xi1>
    %c5_i32 = arith.constant 5 : i32
    %45 = vector.broadcast %c5_i32 : i32 to vector<32x12xi32>
    %46 = arith.select %44, %45, %39 : vector<32x12xi1>, vector<32x12xi32>
    %47 = arith.cmpi slt, %23, %46 : vector<32x12xi32>
    %cst_12 = arith.constant 0.000000e+00 : f32
    %48 = vector.broadcast %cst_12 : f32 to vector<32x12xf32>
    %49 = arith.select %47, %20, %48 : vector<32x12xi1>, vector<32x12xf32>
    %50 = vector.shape_cast %49 : vector<32x12xf32> to vector<2x16x12xf32>
    %cst_13 = arith.constant dense<0xFF800000> : vector<2x12xf32>
    %51 = vector.multi_reduction <maximumf>, %50, %cst_13 [1] : vector<2x16x12xf32> to vector<2x12xf32>
    %52 = arith.truncf %51 : vector<2x12xf32> to vector<2x12xbf16>
    %c0_14 = arith.constant 0 : index
    %c0_15 = arith.constant 0 : index
    %53 = vector.load %arg4[%c0_14, %c0_15] : memref<12x128xbf16, #tpu.memory_space<vmem>>, vector<12x128xbf16>
    %cst_16 = arith.constant dense<0.000000e+00> : vector<2x128xf32>
    %54 = tpu.matmul %52, %53, %cst_16 {dimension_numbers = #tpu.dot_dimension_numbers<[1], [0], [0], [1], [0, 0, 1, 1], [], []>} : vector<2x12xbf16>, vector<12x128xbf16>, vector<2x128xf32> -> vector<2x128xf32>
    %c0_17 = arith.constant 0 : index
    %c0_18 = arith.constant 0 : index
    %55 = vector.load %arg5[%c0_17, %c0_18] : memref<1x128xf32, #tpu.memory_space<vmem>>, vector<1x128xf32>
    %56 = vector.broadcast %55 : vector<1x128xf32> to vector<2x128xf32>
    %57 = arith.addf %54, %56 : vector<2x128xf32>
    %c0_19 = arith.constant 0 : index
    %c0_20 = arith.constant 0 : index
    %58 = vector.load %arg6[%c0_19, %c0_20] : memref<2x128xf32, #tpu.memory_space<vmem>>, vector<2x128xf32>
    tpu.vector_store %arg6[%c0_19, %c0_20], %57 {strides = array<i32>} : memref<2x128xf32, #tpu.memory_space<vmem>>, vector<2x128xf32>,
    return
  }
}

</mosaic_0001>

<bundles_post_ra>
// kernel: textcnn_forward.1
= control target key start
LH: loop header
LB: loop body
LE: loop exit
PB: predicated region body
PF: predicated region fallthrough
CT: control target
= control target key end

     0   :  { %vm76_vm0 = vcmask 1041408   ;;  %v578_v2 = vmov 0   ;;  %s744_s0 = inlined_call_operand.vmem [shape: s32[32,1], index: 0, kind: input, shape index: {}]   ;;  %s745_s1 = inlined_call_operand.vmem [shape: bf16[20,16], index: 1, kind: input, shape index: {}]   ;;  %s746_s2 = inlined_call_operand.vmem [shape: bf16[64,12], index: 2, kind: input, shape index: {}]   ;;  %s747_s3 = inlined_call_operand.vmem [shape: f32[1,12], index: 3, kind: input, shape index: {}]   ;;  %s748_s4 = inlined_call_operand.vmem [shape: bf16[12,128], index: 4, kind: input, shape index: {}]   ;;  %s749_s5 = inlined_call_operand.vmem [shape: f32[1,128], index: 5, kind: input, shape index: {}]   ;;  %s750_s6 = inlined_call_operand.hbm [shape: f32[2,128], index: 6, kind: output, shape index: {}]  }
   0x1   :  { %v27_v0 = vld [vmem:[%s744_s0 + $0x10] sm:$0xff]  ;;  %v25_v1 = vld [vmem:[%s744_s0] sm:$0xff]  ;;  %518 = vset.pattern.permute.xlu1 %v578_v2  ;;  %517 = vset.pattern.permute.xlu0 %v578_v2  ;;  %v28_v3 = vld [vmem:[%s744_s0 + $0x18] sm:$0xff] }
   0x2   :  { %v549_v4 = vld [vmem:[%s745_s1 + $0x8] ss:$0 sps:$4 sm:$0x33]   ;;  %38 = vperm.xlu1 %518, %v27_v0   ;;  %32 = vperm.xlu0 %517, %v25_v1   ;;  %v550_v5 = vld [vmem:[%s745_s1] sm:$0xff]  }
   0x3   :  { %v26_v6 = vld [vmem:[%s744_s0 + $0x8] sm:$0xff]  ;;  %509 = vmatprep.subr.msk.bf16.mxu0 %vm76_vm0, %v549_v4  ;;  %v78_v7 = vsel %vm76_vm0, %v549_v4, 0 }
   0x4   :  { %484 = vmatpush3.bf16.msra.mxu0 %v78_v7 }
   0x5   :  { %485 = vmatprep.subr.bf16.mxu0 %v550_v5 }
   0x6   :  { %41 = vperm.xlu1 %518, %v28_v3   ;;  %35 = vperm.xlu0 %517, %v26_v6  }
   0x8   :  { %486 = vmatpush3.bf16.msra.mxu0 %v550_v5 }
   0x9   :  { %11 = vsyncpa [#allocation3], 0  ;;  %v579_v8 = vmov 0.0   ;;  %v29_v9 = vlaneseq  ;;  %vm69_vm5 = vcmask 162816   ;;  %v551_v21 = vld [vmem:[%s746_s2 + $0x18] sm:$0xff]   ;;  %v552_v25 = vld [vmem:[%s746_s2 + $0x10] sm:$0xff]  }
   0xa   :  { %503 = vmatprep.subr.bf16.mxu0 %v579_v8  ;;  %491 = vmatprep.subr.bf16.mxu1 %v551_v21  ;;  %v553_v32 = vld [vmem:[%s746_s2 + $0x8] sm:$0xff]   ;;  %v554_v42 = vld [vmem:[%s746_s2] sm:$0xff]   ;;  %s580_s15 = smov 16   ;;  %s581_s2 = smov 32   ;;  %vm206_vm9 = vcmask 130048   ;;  %vm211_vm10 = vcmask 261120  }
   0xb   :  { %v641_v10 = vand.u32 127, %v29_v9  ;;  %v656_v23 = vshrl.u32 %v29_v9, 7  ;;  %492 = vmatpush3.bf16.msra.mxu1 %v551_v21  ;;  %s582_s16 = smov 48   ;;  %vm216_vm11 = vcmask 392192   ;;  %vm262_vm12 = vcmask 523264   ;;  %s584_s21 = smov [#allocation2]  }
   0xc   :  { %493 = vmatprep.subr.bf16.mxu1 %v552_v25  ;;  %vm394_vm13 = vcmask 1045504   ;;  %vm583_vm14 = vmmov 0   ;;  %s445_s22 = sshll.u32 %s584_s21, 4  ;;  %s446_s22 = int_to_ptr.vmem [resolvable:$true] %s445_s22 }
   0xd   :  { %vm135_vm6 = vcmp.lt.s32.totalorder %v656_v23, 7  ;;  %vm144_vm7 = vcmp.lt.s32.totalorder %v656_v23, 6  ;;  %vm153_vm8 = vcmp.lt.s32.totalorder %v656_v23, 5  ;;  %vm330_vm15 = vcmp.lt.s32.totalorder %v641_v10, 4  ;;  %s556_s23 = scalar_lea.vmem %s446_s22, 32  ;;  %p561_p1 = scmp.lt.s32.totalorder %s446_s22, %s446_s22 }
   0xe   :  { %vm333_vm0 = vcmp.ge.s32.totalorder %v641_v10, 4  ;;  %p557_p0 = scmp.ne.s32.totalorder %s446_s22, %s556_s23  ;;  %p562_p2 = scmp.lt.s32.totalorder %s556_s23, %s556_s23 }
   0xf   :  { %494 = vmatpush3.bf16.msra.mxu1 %v552_v25 }
  0x10   :  { %495 = vmatprep.subr.bf16.mxu1 %v553_v32  ;;  %p563_p3 = por %p562_p2, %p561_p1 }
  0x12   :  { %p564_p4 = pnand %p563_p3, %p557_p0 }
  0x13   :  { %496 = vmatpush3.bf16.msra.mxu1 %v553_v32  ;;  %v555_v32 = vld [vmem:[%s748_s4] sm:$0x3f]  }
  0x14   :  { %497 = vmatprep.subr.bf16.mxu1 %v554_v42 }
  0x17   :  { %498 = vmatpush3.bf16.msra.mxu1 %v554_v42 }
  0x7d   :  { %v39_v11 = vpop.permute.xlu1 %38  ;;  %v33_v12 = vpop.permute.xlu0 %32 }
  0x7e   :  { %vm45_vm1 = vcmp.eq.s32.totalorder %v39_v11, %v641_v10  ;;  %vm43_vm2 = vcmp.eq.s32.totalorder %v33_v12, %v641_v10 }
  0x7f   :  { %v455_v15 = vsel %vm45_vm1, 1.0, %v579_v8  ;;  %v453_v16 = vsel %vm43_vm2, 1.0, %v579_v8  ;;  %vm334_vm1 = vcmp.lt.s32.totalorder %v641_v10, 8 }
  0x80   :  { %vm335_vm2 = vmand %vm333_vm0, %vm334_vm1 }
  0x81   :  { %v42_v13 = vpop.permute.xlu1 %41  ;;  %v36_v14 = vpop.permute.xlu0 %35 }
  0x82   :  { %vm46_vm3 = vcmp.eq.s32.totalorder %v42_v13, %v641_v10  ;;  %vm44_vm4 = vcmp.eq.s32.totalorder %v36_v14, %v641_v10 }
  0x83   :  { %v456_v17 = vsel %vm46_vm3, 1.0, %v579_v8  ;;  %v454_v18 = vsel %vm44_vm4, 1.0, %v579_v8  ;;  %vm337_vm3 = vcmp.ge.s32.totalorder %v641_v10, 8  ;;  %vm338_vm4 = vcmp.lt.s32.totalorder %v641_v10, 12 }
  0x84   :  { %v56_v19 = vpack.c.bf16 %v456_v17, %v455_v15  ;;  %v55_v20 = vpack.c.bf16 %v454_v18, %v453_v16 }
  0x86   :  { %487 = vmatprep.mubr.msk.bf16.mxu0 %vm69_vm5, %v55_v20 }
  0x87   :  { %488 = vmatmul.mubr.msk.bf16.vlgmr.msra.gmra.mxu0 %vm69_vm5, %v56_v19  ;;  %vm339_vm5 = vmand %vm337_vm3, %vm338_vm4 }
  0x88   :  { %505 = vmatprep.mubr.msk.bf16.mxu0 %vm583_vm14, %v579_v8  ;;  %v461_v8 = vld [vmem:[%s747_s3] ss:$0 sm:$0xff] }
 0x147   :  { %v654_v22 = vpop.f32.mrf.mxu0 }
 0x148   :  { %v131_v27 = vrot.slane %v654_v22, 1  ;;  %v142_v36 = vrot.slane %v654_v22, 2  ;;  %v151_v50 = vrot.slane %v654_v22, 3 }
 0x149   :  { %v658_v24 = vpop.f32.mrf.mxu0 }
 0x14a   :  { %v129_v29 = vrot.slane %v658_v24, 1  ;;  %v140_v37 = vrot.slane %v658_v24, 2  ;;  %v149_v51 = vrot.slane %v658_v24, 3 }
 0x14b   :  { %v663_v26 = vpop.f32.mrf.mxu0 }
 0x14c   :  { %v132_v28 = vrot.slane %v663_v26, 1  ;;  %v143_v30 = vrot.slane %v663_v26, 2  ;;  %v152_v43 = vrot.slane %v663_v26, 3 }
 0x14d   :  { %v670_v31 = vpop.f32.mrf.mxu0 }
 0x14e   :  { %v130_v33 = vrot.slane %v670_v31, 1  ;;  %v141_v34 = vrot.slane %v670_v31, 2  ;;  %v136_v35 = vsel %vm135_vm6, %v131_v27, %v132_v28  ;;  %v139_v38 = vsel %vm135_vm6, %v132_v28, %v129_v29 }
 0x14f   :  { %v519_v39 = vpack.i.bf16 %v139_v38, %v136_v35  ;;  %v145_v45 = vsel %vm144_vm7, %v142_v36, %v143_v30  ;;  %v148_v46 = vsel %vm144_vm7, %v143_v30, %v140_v37  ;;  %v150_v47 = vrot.slane %v670_v31, 3 }
 0x150   :  { %v137_v40 = vsel %vm135_vm6, %v130_v33, %v131_v27  ;;  %v138_v41 = vsel %vm135_vm6, %v129_v29, %v130_v33  ;;  %v146_v48 = vsel %vm144_vm7, %v141_v34, %v142_v36  ;;  %v147_v49 = vsel %vm144_vm7, %v140_v37, %v141_v34 }
 0x151   :  { %v529_v44 = vpack.i.bf16 %v137_v40, %v138_v41  ;;  %520 = vrot.lane.b32.xlu1 %v519_v39, %s580_s15  ;;  %v524_v52 = vpack.i.bf16 %v148_v46, %v145_v45  ;;  %v534_v53 = vpack.i.bf16 %v146_v48, %v147_v49  ;;  %v154_v54 = vsel %vm153_vm8, %v151_v50, %v152_v43 }
 0x152   :  { %v157_v55 = vsel %vm153_vm8, %v152_v43, %v149_v51  ;;  %v155_v56 = vsel %vm153_vm8, %v150_v47, %v151_v50  ;;  %v156_v57 = vsel %vm153_vm8, %v149_v51, %v150_v47  ;;  %v396_v33 = vsel %vm394_vm13, %v555_v32, 0 }
 0x153   :  { %530 = vrot.lane.b32.xlu0 %v529_v44, %s580_s15  ;;  %v544_v58 = vpack.i.bf16 %v157_v55, %v154_v54  ;;  %v539_v59 = vpack.i.bf16 %v155_v56, %v156_v57  ;;  %504 = vmatpush3.bf16.msra.mxu0 %v396_v33  ;;  %v332_v34 = vsel %vm330_vm15, 7, %v578_v2  ;;  %v323_v35 = vadd.s32 16, %v656_v23 }
 0x154   :  { %v336_v36 = vsel %vm335_vm2, 6, %v332_v34  ;;  %v324_v37 = vadd.s32 24, %v656_v23  ;;  %v322_v40 = vadd.s32 8, %v656_v23  ;;  %v325_v43 = vand.u32 15, %v656_v23 }
 0x155   :  { %525 = vrot.lane.b32.xlu1 %v524_v52, %s581_s2  ;;  %v327_v39 = vand.u32 15, %v323_v35  ;;  %v340_v2 = vsel %vm339_vm5, 5, %v336_v36 }
 0x156   :  { %v328_v10 = vand.u32 15, %v324_v37  ;;  %v326_v47 = vand.u32 15, %v322_v40  ;;  %vm341_vm7 = vcmp.lt.s32.totalorder %v325_v43, %v340_v2 }
 0x157   :  { %535 = vrot.lane.b32.xlu0 %v534_v53, %s581_s2  ;;  %vm343_vm6 = vcmp.lt.s32.totalorder %v327_v39, %v340_v2 }
 0x158   :  { %vm344_vm8 = vcmp.lt.s32.totalorder %v328_v10, %v340_v2 }
 0x159   :  { %545 = vrot.lane.b32.xlu1 %v544_v58, %s582_s16 }
 0x15b   :  { %540 = vrot.lane.b32.xlu0 %v539_v59, %s582_s16 }
 0x1c3   :  { %v521_v60 = vpop.permute.xlu1 %520 }
 0x1c4   :  { %v523_v62 = vunpack.i.h.bf16 %v521_v60  ;;  %v522_v63 = vunpack.i.l.bf16 %v521_v60 }
 0x1c5   :  { %v531_v61 = vpop.permute.xlu0 %530 }
 0x1c6   :  { %v533_v1 = vunpack.i.h.bf16 %v531_v61  ;;  %v532_v3 = vunpack.i.l.bf16 %v531_v61  ;;  %v210_v11 = vsel %vm206_vm9, %v663_v26, %v523_v62  ;;  %v209_v12 = vsel %vm206_vm9, %v654_v22, %v522_v63 }
 0x1c7   :  { %v526_v0 = vpop.permute.xlu1 %525 }
 0x1c8   :  { %v528_v5 = vunpack.i.h.bf16 %v526_v0  ;;  %v527_v6 = vunpack.i.l.bf16 %v526_v0  ;;  %v208_v14 = vsel %vm206_vm9, %v670_v31, %v533_v1  ;;  %v207_v15 = vsel %vm206_vm9, %v658_v24, %v532_v3 }
 0x1c9   :  { %v536_v4 = vpop.permute.xlu0 %535  ;;  %vm349_vm9 = vcmask 97280  }
 0x1ca   :  { %v538_v7 = vunpack.i.h.bf16 %v536_v4  ;;  %v537_v9 = vunpack.i.l.bf16 %v536_v4  ;;  %v214_v19 = vsel %vm211_vm10, %v209_v12, %v527_v6  ;;  %v215_v20 = vsel %vm211_vm10, %v210_v11, %v528_v5 }
 0x1cb   :  { %v546_v13 = vpop.permute.xlu1 %545 }
 0x1cc   :  { %v548_v16 = vunpack.i.h.bf16 %v546_v13  ;;  %v547_v17 = vunpack.i.l.bf16 %v546_v13  ;;  %v212_v22 = vsel %vm211_vm10, %v207_v15, %v537_v9  ;;  %v213_v28 = vsel %vm211_vm10, %v208_v14, %v538_v7 }
 0x1cd   :  { %v541_v18 = vpop.permute.xlu0 %540  ;;  %vm342_vm10 = vcmp.lt.s32.totalorder %v326_v47, %v340_v2 }
 0x1ce   :  { %v543_v21 = vunpack.i.h.bf16 %v541_v18  ;;  %v542_v25 = vunpack.i.l.bf16 %v541_v18  ;;  %v219_v27 = vsel %vm216_vm11, %v214_v19, %v547_v17  ;;  %v220_v26 = vsel %vm216_vm11, %v215_v20, %v548_v16  ;;  %v468_v20 = vld [vmem:[%s749_s5] ss:$0 sm:$0xff] }
 0x1cf   :  { %v222_v31 = vpack.c.bf16 %v220_v26, %v219_v27 }
 0x1d0   :  { %v217_v29 = vsel %vm216_vm11, %v212_v22, %v542_v25  ;;  %v218_v24 = vsel %vm216_vm11, %v213_v28, %v543_v21  ;;  %vm383_vm11 = vcmask 1041409  }
 0x1d1   :  { %v221_v30 = vpack.c.bf16 %v218_v24, %v217_v29 }
 0x1d3   :  { %499 = vmatprep.mubr.msk.bf16.mxu1 %vm262_vm12, %v221_v30 }
 0x1d4   :  { %500 = vmatmul.mubr.msk.bf16.vlgmr.msra.gmra.mxu1 %vm262_vm12, %v222_v31 }
 0x294   :  { %v501_v38 = vpop.f32.mrf.mxu1 }
 0x295   :  { %v312_v41 = vadd.f32 %v501_v38, %v461_v8 }
 0x296   :  { %v303_v42 = vpop.f32.mrf.mxu1 }
 0x297   :  { %v320_v44 = vmax.f32 %v312_v41, 0.0  ;;  %v304_v45 = vadd.f32 %v461_v8, %v303_v42 }
 0x298   :  { %v502_v46 = vpop.f32.mrf.mxu1 }
 0x299   :  { %v318_v48 = vmax.f32 %v304_v45, 0.0  ;;  %v315_v49 = vadd.f32 %v502_v46, %v461_v8  ;;  %v347_v51 = vsel %vm343_vm6, %v320_v44, 0.0 }
 0x29a   :  { %v306_v50 = vpop.f32.mrf.mxu1  ;;  %v359_v23 = vsel %vm349_vm9, %v347_v51, -inf }
 0x29b   :  { %v321_v52 = vmax.f32 %v315_v49, 0.0  ;;  %v307_v53 = vadd.f32 %v461_v8, %v306_v50  ;;  %v345_v54 = vsel %vm341_vm7, %v318_v48, 0.0 }
 0x29c   :  { %v350_v60 = vsel %vm349_vm9, %v345_v54, -inf }
 0x29d   :  { %v348_v55 = vsel %vm344_vm8, %v321_v52, 0.0  ;;  %v319_v56 = vmax.f32 %v307_v53, 0.0 }
 0x29e   :  { %v360_v57 = vsel %vm349_vm9, %v348_v55, -inf }
 0x29f   :  { %v361_v58 = vmax.f32 %v359_v23, %v360_v57  ;;  %v346_v59 = vsel %vm342_vm10, %v319_v56, 0.0 }
 0x2a0   :  { %v351_v61 = vsel %vm349_vm9, %v346_v59, -inf }
 0x2a1   :  { %v362_v62 = vrot.slane %v361_v58, 4  ;;  %v352_v63 = vmax.f32 %v350_v60, %v351_v61 }
 0x2a3   :  { %v363_v0 = vmax.f32 %v361_v58, %v362_v62  ;;  %v353_v1 = vrot.slane %v352_v63, 4 }
 0x2a5   :  { %v364_v3 = vrot.slane %v363_v0, 2  ;;  %v354_v4 = vmax.f32 %v352_v63, %v353_v1 }
 0x2a7   :  { %v365_v5 = vmax.f32 %v363_v0, %v364_v3  ;;  %v355_v6 = vrot.slane %v354_v4, 2 }
 0x2a9   :  { %v366_v7 = vrot.slane %v365_v5, 1  ;;  %v356_v9 = vmax.f32 %v354_v4, %v355_v6 }
 0x2ab   :  { %v367_v11 = vmax.f32 %v365_v5, %v366_v7  ;;  %v357_v12 = vrot.slane %v356_v9, 1 }
 0x2ad   :  { %v369_v13 = vpack.c.bf16 %v367_v11, %v367_v11  ;;  %v358_v14 = vmax.f32 %v356_v9, %v357_v12 }
 0x2af   :  { %v368_v15 = vpack.c.bf16 %v358_v14, %v358_v14  ;;  %v382_v16 = vunpack.c.l.b16 %v369_v13 }
 0x2b1   :  { %v381_v17 = vunpack.c.l.b16 %v368_v15 }
 0x2b3   :  { %v384_v18 = vsel %vm383_vm11, %v382_v16, %v381_v17 }
 0x2b4   :  { %v385_v19 = vpack.c.b16 %v384_v18, %v384_v18 }
 0x2b6   :  { %506 = vmatmul.mubr.msk.bf16.vlgmr.msra.gmra.mxu0 %vm349_vm9, %v385_v19 }
 0x376   :  { %v432_v21 = vpop.f32.mrf.mxu0 }
 0x377   :  { %v433_v25 = vadd.f32 %v468_v20, %v432_v21 }
 0x378   :  { %v507_v27 = vpop.f32.mrf.mxu0 }
 0x379   :  { %438 = vst [vmem:[#allocation2] sm:$0x3] %v433_v25 }
 0x37a   :  { %v435_v26 = vpop.f32.mrf.mxu0 }
 0x37b   :  { %567 = shalt.err (!%p564_p4)
}
 0x37c   :  { %448 = dma.vmem_to_hbm [thread:$0]  %s446_s22, 32, %s750_s6, [#allocation3]   ;;  %v508_v22 = vpop.f32.mrf.mxu0 }
 0x37d   :  { %576 = dma.done.wait [#allocation3], 32  }
 0x37e   :  { %577 = vsyncadd [#allocation3], 4294967264 }
 0x37f   :  { %452 = vsyncpa [#allocation3], 1 }

</bundles_post_ra>
